<compile_context>
chip_gen: v5e
topology: v5e:2x2
jax: 0.10.0
libtpu: 0.0.40
codegen_flags: <defaults>
</compile_context>

<pallas_src>
import jax
import jax.numpy as jnp
from jax.experimental import pallas as pl
from jax.experimental.pallas import tpu as pltpu

# ---- small, module-consistent sizes -----------------------------------------
HIDDEN = 32            # bert hidden_size
SEQ = 8                # sequence length
BATCH = 2              # classifier batch (title/context batch is 2*BATCH)
NUM_CLASSES = 5
NUM_SECTION = 10
NUM_SECTION_PAD = 16   # section table rows padded for a clean one-hot matmul
SEC_EMB = 256          # hard-coded 256-dim section embedding in the module
VOCAB = 64
VOCAB_PAD = 128        # token table rows padded to a full 128-lane one-hot
SLOTS = 5              # sen | title-even | title-odd | ctx-even | ctx-odd
FEATURE_SIZE = HIDDEN + 2 * HIDDEN + 2 * HIDDEN + SEC_EMB   # 416
CLS_PAD = 128          # logits padded to a full 128-lane block


# -----------------------------------------------------------------------------
# Fused kernel: token gather + masked mean pool + (folded) encoder + pooler +
#               section gather-into-logits + slot-batched classifier head.
# -----------------------------------------------------------------------------
def _bert_classifier_kernel(ids_ref, mask_ref, sec_ids_ref,
                            tok_emb_ref, w_pool_ref, w_text_ref,
                            sec_cls_ref, bias_ref, out_ref):
    rows, seq = ids_ref.shape            # (SLOTS*bp, S)
    vocab = tok_emb_ref.shape[0]         # 128 (padded)
    hidden = tok_emb_ref.shape[1]        # 32
    slots = w_text_ref.shape[0]          # 5
    bp = sec_ids_ref.shape[0]            # padded per-example batch (multiple of 8)
    n_sec = sec_cls_ref.shape[0]         # 16

    ids = ids_ref[...]                   # (rows, S) int32
    mask = mask_ref[...]                 # (rows, S) f32

    # Packed biases: row0 = b_enc (lanes [:H]), row1 = b_pool, row2 = b_cls.
    b_enc = bias_ref[0:1, :hidden]
    b_pool = bias_ref[1:2, :hidden]
    b_cls = bias_ref[2:3, :]

    # --- masked mean-pool denominator: one XLU reduce -------------------------
    denom = jnp.maximum(jnp.sum(mask, axis=1, keepdims=True), 1.0)     # (rows,1)

    # --- token-embedding gather as one-hot counts (full-lane vregs) -----------
    # counts[r, v] = sum_s mask[r, s] * [ids[r, s] == v]
    vocab_iota = jax.lax.broadcasted_iota(jnp.int32, (rows, vocab), 1)
    counts = jnp.zeros((rows, vocab), jnp.float32)
    for s in range(seq):                 # static unroll, S is tiny
        counts = counts + jnp.where(vocab_iota == ids[:, s:s + 1],
                                    mask[:, s:s + 1], 0.0)

    # --- encoder fused into the token table (w_enc folded offline) ------------
    # h = tanh(((counts @ tok_emb) / denom) @ w_enc + b_enc)
    #   = tanh((counts @ (tok_emb @ w_enc)) / denom + b_enc)
    h = jnp.tanh(jnp.dot(counts, tok_emb_ref[...],
                         preferred_element_type=jnp.float32) / denom + b_enc)
    pooled = jnp.tanh(jnp.dot(h, w_pool_ref[...],
                              preferred_element_type=jnp.float32) + b_pool)

    # --- section gather directly into logit space (w_sec folded offline) ------
    sec_iota = jax.lax.broadcasted_iota(jnp.int32, (bp, n_sec), 1)
    sec_oh = (sec_iota == sec_ids_ref[...]).astype(jnp.float32)        # (bp, 16)
    logits = b_cls + jnp.dot(sec_oh, sec_cls_ref[...],
                             preferred_element_type=jnp.float32)       # (bp, 128)

    # --- slot-batched classifier accumulate (exactly the needed FLOPs) --------
    for k in range(slots):               # tile-aligned (8, H) @ (H, 128)
        logits = logits + jnp.dot(pooled[k * bp:(k + 1) * bp, :], w_text_ref[k],
                                  preferred_element_type=jnp.float32)
    out_ref[...] = logits.astype(out_ref.dtype)


# -----------------------------------------------------------------------------
# Wrapper: one-time parameter repacking/folding + id/mask stacking +
#          a single pallas_call.
# -----------------------------------------------------------------------------
def prepare_params(raw):
    """Fold / repack PyTorch-layout params into MXU & lane-friendly layouts."""
    h, c = HIDDEN, NUM_CLASSES
    w_cls = raw["w_cls"]                                   # (416, 5), cat order

    # Fold the synthetic-encoder weight into the token table, pad vocab to 128.
    tok_emb_enc = jnp.zeros((VOCAB_PAD, h), jnp.float32).at[:VOCAB].set(
        raw["tok_emb"] @ raw["w_enc"])

    # Slot-stacked classifier weight: (SLOTS, H, 128), classes in lanes [:C].
    w_text = jnp.zeros((SLOTS, h, CLS_PAD), jnp.float32)
    for k in range(SLOTS):
        w_text = w_text.at[k, :, :c].set(w_cls[k * h:(k + 1) * h, :])

    # Fold the section slice of the classifier into the section table: (16, 128).
    sec_cls = jnp.zeros((NUM_SECTION_PAD, CLS_PAD), jnp.float32).at[
        :NUM_SECTION, :c].set(raw["sec_emb"] @ w_cls[SLOTS * h:, :])

    # Packed biases in one (8, 128) buffer.
    bias = jnp.zeros((8, CLS_PAD), jnp.float32)
    bias = bias.at[0, :h].set(raw["b_enc"].reshape(-1))
    bias = bias.at[1, :h].set(raw["b_pool"].reshape(-1))
    bias = bias.at[2, :c].set(raw["b_cls"])

    return {
        "tok_emb_enc": tok_emb_enc,
        "w_pool": raw["w_pool"],
        "w_text": w_text,
        "sec_cls": sec_cls,
        "bias": bias,
    }


def bert_classifier_forward(params, input_ids, title_ids, context_ids, sec_ids,
                            attention_mask, title_attention_mask,
                            context_attention_mask):
    b = input_ids.shape[0]
    bp = max(8, ((b + 7) // 8) * 8)      # pad per-slot batch to 8 sublanes

    def pad_rows(x):
        return jnp.pad(x, ((0, bp - x.shape[0]), (0, 0)))

    # Slot-major stacking so every pooled slot block is an aligned 8-row tile:
    #   [ sen | title[0::2] | title[1::2] | context[0::2] | context[1::2] ]
    # (matches title_outputs[1].reshape(-1, 2H) / context reshape semantics).
    ids = jnp.concatenate(
        [pad_rows(input_ids),
         pad_rows(title_ids[0::2]), pad_rows(title_ids[1::2]),
         pad_rows(context_ids[0::2]), pad_rows(context_ids[1::2])],
        axis=0).astype(jnp.int32)                                  # (5*bp, S)
    mask = jnp.concatenate(
        [pad_rows(attention_mask),
         pad_rows(title_attention_mask[0::2]), pad_rows(title_attention_mask[1::2]),
         pad_rows(context_attention_mask[0::2]), pad_rows(context_attention_mask[1::2])],
        axis=0).astype(jnp.float32)                                # (5*bp, S)
    sec = jnp.pad(sec_ids.astype(jnp.int32), (0, bp - b)).reshape(bp, 1)

    vmem = lambda: pl.BlockSpec(memory_space=pltpu.MemorySpace.VMEM)
    logits_pad = pl.pallas_call(
        _bert_classifier_kernel,
        out_shape=jax.ShapeDtypeStruct((bp, CLS_PAD), jnp.float32),
        in_specs=[vmem() for _ in range(8)],
        out_specs=vmem(),
    )(ids, mask, sec,
      params["tok_emb_enc"], params["w_pool"], params["w_text"],
      params["sec_cls"], params["bias"])

    # nn.Dropout in eval mode is identity; slice away padding.
    return logits_pad[:b, :NUM_CLASSES]


# -----------------------------------------------------------------------------
# Pure-JAX reference (mirrors the PyTorch module math) for a correctness check.
# -----------------------------------------------------------------------------
def _reference_forward(raw, input_ids, title_ids, context_ids, sec_ids,
                       attention_mask, title_attention_mask,
                       context_attention_mask):
    def pool(ids_, mask_):
        emb = raw["tok_emb"][ids_]                                  # (N, S, H)
        denom = jnp.maximum(mask_.sum(1, keepdims=True), 1.0)
        ctx = (emb * mask_[:, :, None]).sum(1) / denom
        h = jnp.tanh(ctx @ raw["w_enc"] + raw["b_enc"])
        return jnp.tanh(h @ raw["w_pool"] + raw["b_pool"])
    sen = pool(input_ids, attention_mask)
    title = pool(title_ids, title_attention_mask).reshape(-1, 2 * HIDDEN)
    context = pool(context_ids, context_attention_mask).reshape(-1, 2 * HIDDEN)
    sec = raw["sec_emb"][sec_ids]
    feat = jnp.concatenate([sen, title, context, sec], axis=1)
    return feat @ raw["w_cls"] + raw["b_cls"].reshape(1, -1)


def init_params(key):
    ks = jax.random.split(key, 8)
    s = 0.02
    return {
        "tok_emb": s * jax.random.normal(ks[0], (VOCAB, HIDDEN), jnp.float32),
        "w_enc":   s * jax.random.normal(ks[1], (HIDDEN, HIDDEN), jnp.float32),
        "b_enc":   s * jax.random.normal(ks[2], (1, HIDDEN), jnp.float32),
        "w_pool":  s * jax.random.normal(ks[3], (HIDDEN, HIDDEN), jnp.float32),
        "b_pool":  s * jax.random.normal(ks[4], (1, HIDDEN), jnp.float32),
        "sec_emb": s * jax.random.normal(ks[5], (NUM_SECTION, SEC_EMB), jnp.float32),
        "w_cls":   s * jax.random.normal(ks[6], (FEATURE_SIZE, NUM_CLASSES), jnp.float32),
        "b_cls":   s * jax.random.normal(ks[7], (NUM_CLASSES,), jnp.float32),
    }


if __name__ == "__main__":
    key = jax.random.PRNGKey(0)
    pkey, k1, k2, k3, k4 = jax.random.split(key, 5)
    raw_params = init_params(pkey)
    params = prepare_params(raw_params)

    input_ids = jax.random.randint(k1, (BATCH, SEQ), 0, VOCAB, jnp.int32)
    title_ids = jax.random.randint(k2, (2 * BATCH, SEQ), 0, VOCAB, jnp.int32)
    context_ids = jax.random.randint(k3, (2 * BATCH, SEQ), 0, VOCAB, jnp.int32)
    sec_ids = jax.random.randint(k4, (BATCH,), 0, NUM_SECTION, jnp.int32)

    attention_mask = jnp.ones((BATCH, SEQ), jnp.float32)
    title_attention_mask = jnp.ones((2 * BATCH, SEQ), jnp.float32)
    context_attention_mask = jnp.ones((2 * BATCH, SEQ), jnp.float32)

    logits = jax.jit(bert_classifier_forward)(
        params, input_ids, title_ids, context_ids, sec_ids,
        attention_mask, title_attention_mask, context_attention_mask)
    logits = jax.block_until_ready(logits)

    ref = _reference_forward(
        raw_params, input_ids, title_ids, context_ids, sec_ids,
        attention_mask, title_attention_mask, context_attention_mask)

    assert logits.shape == (BATCH, NUM_CLASSES), logits.shape
    assert bool(jnp.all(jnp.isfinite(logits)))
    assert bool(jnp.allclose(logits, ref, rtol=1e-3, atol=1e-4)), (logits, ref)
    print("KERNEL_OK")
</pallas_src>

<mosaic_0001>
module attributes {stable_mosaic.version = 11 : i64} {
  func.func @_bert_classifier_kernel(%arg0: memref<40x8xi32, #tpu.memory_space<vmem>>, %arg1: memref<40x8xf32, #tpu.memory_space<vmem>>, %arg2: memref<8x1xi32, #tpu.memory_space<vmem>>, %arg3: memref<128x32xf32, #tpu.memory_space<vmem>>, %arg4: memref<32x32xf32, #tpu.memory_space<vmem>>, %arg5: memref<5x32x128xf32, #tpu.memory_space<vmem>>, %arg6: memref<16x128xf32, #tpu.memory_space<vmem>>, %arg7: memref<8x128xf32, #tpu.memory_space<vmem>>, %arg8: memref<8x128xf32, #tpu.memory_space<vmem>>) attributes {dimension_semantics = [], scalar_prefetch = 0 : i64, scratch_operands = 0 : i64, tpu.core_type = #tpu.core_type<tc>} {
    %c0 = arith.constant 0 : index
    %c0_0 = arith.constant 0 : index
    %0 = vector.load %arg0[%c0, %c0_0] : memref<40x8xi32, #tpu.memory_space<vmem>>, vector<40x8xi32>
    %c0_1 = arith.constant 0 : index
    %c0_2 = arith.constant 0 : index
    %1 = vector.load %arg1[%c0_1, %c0_2] : memref<40x8xf32, #tpu.memory_space<vmem>>, vector<40x8xf32>
    %c0_3 = arith.constant 0 : index
    %c0_4 = arith.constant 0 : index
    %2 = vector.load %arg7[%c0_3, %c0_4] : memref<8x128xf32, #tpu.memory_space<vmem>>, vector<1x32xf32>
    %c1 = arith.constant 1 : index
    %c0_5 = arith.constant 0 : index
    %3 = vector.load %arg7[%c1, %c0_5] : memref<8x128xf32, #tpu.memory_space<vmem>>, vector<1x32xf32>
    %c2 = arith.constant 2 : index
    %c0_6 = arith.constant 0 : index
    %4 = vector.load %arg7[%c2, %c0_6] : memref<8x128xf32, #tpu.memory_space<vmem>>, vector<1x128xf32>
    %cst = arith.constant dense<0.000000e+00> : vector<40xf32>
    %5 = vector.multi_reduction <add>, %1, %cst [1] : vector<40x8xf32> to vector<40xf32>
    %6 = vector.shape_cast %5 : vector<40xf32> to vector<40x1xf32>
    %cst_7 = arith.constant 1.000000e+00 : f32
    %7 = vector.broadcast %cst_7 : f32 to vector<40x1xf32>
    %8 = arith.maximumf %6, %7 : vector<40x1xf32>
    %9 = tpu.iota {dimensions = array<i32: 1>} : vector<40x128xi32>
    %cst_8 = arith.constant 0.000000e+00 : f32
    %10 = vector.broadcast %cst_8 : f32 to vector<40x128xf32>
    %11 = vector.extract_strided_slice %0 {offsets = [0, 0], sizes = [40, 1], strides = [1, 1]} : vector<40x8xi32> to vector<40x1xi32>
    %12 = vector.broadcast %11 : vector<40x1xi32> to vector<40x128xi32>
    %13 = arith.cmpi eq, %9, %12 : vector<40x128xi32>
    %14 = vector.extract_strided_slice %1 {offsets = [0, 0], sizes = [40, 1], strides = [1, 1]} : vector<40x8xf32> to vector<40x1xf32>
    %cst_9 = arith.constant 0.000000e+00 : f32
    %15 = vector.shape_cast %14 : vector<40x1xf32> to vector<40x1xf32>
    %16 = vector.broadcast %15 : vector<40x1xf32> to vector<40x128xf32>
    %17 = vector.broadcast %cst_9 : f32 to vector<40x128xf32>
    %18 = arith.select %13, %16, %17 : vector<40x128xi1>, vector<40x128xf32>
    %19 = arith.addf %10, %18 : vector<40x128xf32>
    %20 = vector.extract_strided_slice %0 {offsets = [0, 1], sizes = [40, 1], strides = [1, 1]} : vector<40x8xi32> to vector<40x1xi32>
    %21 = vector.broadcast %20 : vector<40x1xi32> to vector<40x128xi32>
    %22 = arith.cmpi eq, %9, %21 : vector<40x128xi32>
    %23 = vector.extract_strided_slice %1 {offsets = [0, 1], sizes = [40, 1], strides = [1, 1]} : vector<40x8xf32> to vector<40x1xf32>
    %cst_10 = arith.constant 0.000000e+00 : f32
    %24 = vector.shape_cast %23 : vector<40x1xf32> to vector<40x1xf32>
    %25 = vector.broadcast %24 : vector<40x1xf32> to vector<40x128xf32>
    %26 = vector.broadcast %cst_10 : f32 to vector<40x128xf32>
    %27 = arith.select %22, %25, %26 : vector<40x128xi1>, vector<40x128xf32>
    %28 = arith.addf %19, %27 : vector<40x128xf32>
    %29 = vector.extract_strided_slice %0 {offsets = [0, 2], sizes = [40, 1], strides = [1, 1]} : vector<40x8xi32> to vector<40x1xi32>
    %30 = vector.broadcast %29 : vector<40x1xi32> to vector<40x128xi32>
    %31 = arith.cmpi eq, %9, %30 : vector<40x128xi32>
    %32 = vector.extract_strided_slice %1 {offsets = [0, 2], sizes = [40, 1], strides = [1, 1]} : vector<40x8xf32> to vector<40x1xf32>
    %cst_11 = arith.constant 0.000000e+00 : f32
    %33 = vector.shape_cast %32 : vector<40x1xf32> to vector<40x1xf32>
    %34 = vector.broadcast %33 : vector<40x1xf32> to vector<40x128xf32>
    %35 = vector.broadcast %cst_11 : f32 to vector<40x128xf32>
    %36 = arith.select %31, %34, %35 : vector<40x128xi1>, vector<40x128xf32>
    %37 = arith.addf %28, %36 : vector<40x128xf32>
    %38 = vector.extract_strided_slice %0 {offsets = [0, 3], sizes = [40, 1], strides = [1, 1]} : vector<40x8xi32> to vector<40x1xi32>
    %39 = vector.broadcast %38 : vector<40x1xi32> to vector<40x128xi32>
    %40 = arith.cmpi eq, %9, %39 : vector<40x128xi32>
    %41 = vector.extract_strided_slice %1 {offsets = [0, 3], sizes = [40, 1], strides = [1, 1]} : vector<40x8xf32> to vector<40x1xf32>
    %cst_12 = arith.constant 0.000000e+00 : f32
    %42 = vector.shape_cast %41 : vector<40x1xf32> to vector<40x1xf32>
    %43 = vector.broadcast %42 : vector<40x1xf32> to vector<40x128xf32>
    %44 = vector.broadcast %cst_12 : f32 to vector<40x128xf32>
    %45 = arith.select %40, %43, %44 : vector<40x128xi1>, vector<40x128xf32>
    %46 = arith.addf %37, %45 : vector<40x128xf32>
    %47 = vector.extract_strided_slice %0 {offsets = [0, 4], sizes = [40, 1], strides = [1, 1]} : vector<40x8xi32> to vector<40x1xi32>
    %48 = vector.broadcast %47 : vector<40x1xi32> to vector<40x128xi32>
    %49 = arith.cmpi eq, %9, %48 : vector<40x128xi32>
    %50 = vector.extract_strided_slice %1 {offsets = [0, 4], sizes = [40, 1], strides = [1, 1]} : vector<40x8xf32> to vector<40x1xf32>
    %cst_13 = arith.constant 0.000000e+00 : f32
    %51 = vector.shape_cast %50 : vector<40x1xf32> to vector<40x1xf32>
    %52 = vector.broadcast %51 : vector<40x1xf32> to vector<40x128xf32>
    %53 = vector.broadcast %cst_13 : f32 to vector<40x128xf32>
    %54 = arith.select %49, %52, %53 : vector<40x128xi1>, vector<40x128xf32>
    %55 = arith.addf %46, %54 : vector<40x128xf32>
    %56 = vector.extract_strided_slice %0 {offsets = [0, 5], sizes = [40, 1], strides = [1, 1]} : vector<40x8xi32> to vector<40x1xi32>
    %57 = vector.broadcast %56 : vector<40x1xi32> to vector<40x128xi32>
    %58 = arith.cmpi eq, %9, %57 : vector<40x128xi32>
    %59 = vector.extract_strided_slice %1 {offsets = [0, 5], sizes = [40, 1], strides = [1, 1]} : vector<40x8xf32> to vector<40x1xf32>
    %cst_14 = arith.constant 0.000000e+00 : f32
    %60 = vector.shape_cast %59 : vector<40x1xf32> to vector<40x1xf32>
    %61 = vector.broadcast %60 : vector<40x1xf32> to vector<40x128xf32>
    %62 = vector.broadcast %cst_14 : f32 to vector<40x128xf32>
    %63 = arith.select %58, %61, %62 : vector<40x128xi1>, vector<40x128xf32>
    %64 = arith.addf %55, %63 : vector<40x128xf32>
    %65 = vector.extract_strided_slice %0 {offsets = [0, 6], sizes = [40, 1], strides = [1, 1]} : vector<40x8xi32> to vector<40x1xi32>
    %66 = vector.broadcast %65 : vector<40x1xi32> to vector<40x128xi32>
    %67 = arith.cmpi eq, %9, %66 : vector<40x128xi32>
    %68 = vector.extract_strided_slice %1 {offsets = [0, 6], sizes = [40, 1], strides = [1, 1]} : vector<40x8xf32> to vector<40x1xf32>
    %cst_15 = arith.constant 0.000000e+00 : f32
    %69 = vector.shape_cast %68 : vector<40x1xf32> to vector<40x1xf32>
    %70 = vector.broadcast %69 : vector<40x1xf32> to vector<40x128xf32>
    %71 = vector.broadcast %cst_15 : f32 to vector<40x128xf32>
    %72 = arith.select %67, %70, %71 : vector<40x128xi1>, vector<40x128xf32>
    %73 = arith.addf %64, %72 : vector<40x128xf32>
    %74 = vector.extract_strided_slice %0 {offsets = [0, 7], sizes = [40, 1], strides = [1, 1]} : vector<40x8xi32> to vector<40x1xi32>
    %75 = vector.broadcast %74 : vector<40x1xi32> to vector<40x128xi32>
    %76 = arith.cmpi eq, %9, %75 : vector<40x128xi32>
    %77 = vector.extract_strided_slice %1 {offsets = [0, 7], sizes = [40, 1], strides = [1, 1]} : vector<40x8xf32> to vector<40x1xf32>
    %cst_16 = arith.constant 0.000000e+00 : f32
    %78 = vector.shape_cast %77 : vector<40x1xf32> to vector<40x1xf32>
    %79 = vector.broadcast %78 : vector<40x1xf32> to vector<40x128xf32>
    %80 = vector.broadcast %cst_16 : f32 to vector<40x128xf32>
    %81 = arith.select %76, %79, %80 : vector<40x128xi1>, vector<40x128xf32>
    %82 = arith.addf %73, %81 : vector<40x128xf32>
    %c0_17 = arith.constant 0 : index
    %c0_18 = arith.constant 0 : index
    %83 = vector.load %arg3[%c0_17, %c0_18] : memref<128x32xf32, #tpu.memory_space<vmem>>, vector<128x32xf32>
    %cst_19 = arith.constant dense<0.000000e+00> : vector<40x32xf32>
    %84 = tpu.matmul %82, %83, %cst_19 {dimension_numbers = #tpu.dot_dimension_numbers<[1], [0], [0], [1], [0, 0, 1, 1], [], []>} : vector<40x128xf32>, vector<128x32xf32>, vector<40x32xf32> -> vector<40x32xf32>
    %85 = vector.broadcast %8 : vector<40x1xf32> to vector<40x32xf32>
    %86 = arith.divf %84, %85 : vector<40x32xf32>
    %87 = vector.broadcast %2 : vector<1x32xf32> to vector<40x32xf32>
    %88 = arith.addf %86, %87 : vector<40x32xf32>
    %89 = math.tanh %88 : vector<40x32xf32>
    %c0_20 = arith.constant 0 : index
    %c0_21 = arith.constant 0 : index
    %90 = vector.load %arg4[%c0_20, %c0_21] : memref<32x32xf32, #tpu.memory_space<vmem>>, vector<32x32xf32>
    %cst_22 = arith.constant dense<0.000000e+00> : vector<40x32xf32>
    %91 = tpu.matmul %89, %90, %cst_22 {dimension_numbers = #tpu.dot_dimension_numbers<[1], [0], [0], [1], [0, 0, 1, 1], [], []>} : vector<40x32xf32>, vector<32x32xf32>, vector<40x32xf32> -> vector<40x32xf32>
    %92 = vector.broadcast %3 : vector<1x32xf32> to vector<40x32xf32>
    %93 = arith.addf %91, %92 : vector<40x32xf32>
    %94 = math.tanh %93 : vector<40x32xf32>
    %95 = tpu.iota {dimensions = array<i32: 1>} : vector<8x16xi32>
    %c0_23 = arith.constant 0 : index
    %c0_24 = arith.constant 0 : index
    %96 = vector.load %arg2[%c0_23, %c0_24] : memref<8x1xi32, #tpu.memory_space<vmem>>, vector<8x1xi32>
    %97 = vector.broadcast %96 : vector<8x1xi32> to vector<8x16xi32>
    %98 = arith.cmpi eq, %95, %97 : vector<8x16xi32>
    %99 = arith.extui %98 : vector<8x16xi1> to vector<8x16xi32>
    %100 = arith.sitofp %99 : vector<8x16xi32> to vector<8x16xf32>
    %c0_25 = arith.constant 0 : index
    %c0_26 = arith.constant 0 : index
    %101 = vector.load %arg6[%c0_25, %c0_26] : memref<16x128xf32, #tpu.memory_space<vmem>>, vector<16x128xf32>
    %cst_27 = arith.constant dense<0.000000e+00> : vector<8x128xf32>
    %102 = tpu.matmul %100, %101, %cst_27 {dimension_numbers = #tpu.dot_dimension_numbers<[1], [0], [0], [1], [0, 0, 1, 1], [], []>} : vector<8x16xf32>, vector<16x128xf32>, vector<8x128xf32> -> vector<8x128xf32>
    %103 = vector.broadcast %4 : vector<1x128xf32> to vector<8x128xf32>
    %104 = arith.addf %103, %102 : vector<8x128xf32>
    %105 = vector.extract_strided_slice %94 {offsets = [0, 0], sizes = [8, 32], strides = [1, 1]} : vector<40x32xf32> to vector<8x32xf32>
    %c0_28 = arith.constant 0 : index
    %c0_29 = arith.constant 0 : index
    %c0_30 = arith.constant 0 : index
    %106 = vector.load %arg5[%c0_28, %c0_29, %c0_30] : memref<5x32x128xf32, #tpu.memory_space<vmem>>, vector<1x32x128xf32>
    %107 = vector.shape_cast %106 : vector<1x32x128xf32> to vector<32x128xf32>
    %cst_31 = arith.constant dense<0.000000e+00> : vector<8x128xf32>
    %108 = tpu.matmul %105, %107, %cst_31 {dimension_numbers = #tpu.dot_dimension_numbers<[1], [0], [0], [1], [0, 0, 1, 1], [], []>} : vector<8x32xf32>, vector<32x128xf32>, vector<8x128xf32> -> vector<8x128xf32>
    %109 = arith.addf %104, %108 : vector<8x128xf32>
    %110 = vector.extract_strided_slice %94 {offsets = [8, 0], sizes = [8, 32], strides = [1, 1]} : vector<40x32xf32> to vector<8x32xf32>
    %c1_32 = arith.constant 1 : index
    %c0_33 = arith.constant 0 : index
    %c0_34 = arith.constant 0 : index
    %111 = vector.load %arg5[%c1_32, %c0_33, %c0_34] : memref<5x32x128xf32, #tpu.memory_space<vmem>>, vector<1x32x128xf32>
    %112 = vector.shape_cast %111 : vector<1x32x128xf32> to vector<32x128xf32>
    %cst_35 = arith.constant dense<0.000000e+00> : vector<8x128xf32>
    %113 = tpu.matmul %110, %112, %cst_35 {dimension_numbers = #tpu.dot_dimension_numbers<[1], [0], [0], [1], [0, 0, 1, 1], [], []>} : vector<8x32xf32>, vector<32x128xf32>, vector<8x128xf32> -> vector<8x128xf32>
    %114 = arith.addf %109, %113 : vector<8x128xf32>
    %115 = vector.extract_strided_slice %94 {offsets = [16, 0], sizes = [8, 32], strides = [1, 1]} : vector<40x32xf32> to vector<8x32xf32>
    %c2_36 = arith.constant 2 : index
    %c0_37 = arith.constant 0 : index
    %c0_38 = arith.constant 0 : index
    %116 = vector.load %arg5[%c2_36, %c0_37, %c0_38] : memref<5x32x128xf32, #tpu.memory_space<vmem>>, vector<1x32x128xf32>
    %117 = vector.shape_cast %116 : vector<1x32x128xf32> to vector<32x128xf32>
    %cst_39 = arith.constant dense<0.000000e+00> : vector<8x128xf32>
    %118 = tpu.matmul %115, %117, %cst_39 {dimension_numbers = #tpu.dot_dimension_numbers<[1], [0], [0], [1], [0, 0, 1, 1], [], []>} : vector<8x32xf32>, vector<32x128xf32>, vector<8x128xf32> -> vector<8x128xf32>
    %119 = arith.addf %114, %118 : vector<8x128xf32>
    %120 = vector.extract_strided_slice %94 {offsets = [24, 0], sizes = [8, 32], strides = [1, 1]} : vector<40x32xf32> to vector<8x32xf32>
    %c3 = arith.constant 3 : index
    %c0_40 = arith.constant 0 : index
    %c0_41 = arith.constant 0 : index
    %121 = vector.load %arg5[%c3, %c0_40, %c0_41] : memref<5x32x128xf32, #tpu.memory_space<vmem>>, vector<1x32x128xf32>
    %122 = vector.shape_cast %121 : vector<1x32x128xf32> to vector<32x128xf32>
    %cst_42 = arith.constant dense<0.000000e+00> : vector<8x128xf32>
    %123 = tpu.matmul %120, %122, %cst_42 {dimension_numbers = #tpu.dot_dimension_numbers<[1], [0], [0], [1], [0, 0, 1, 1], [], []>} : vector<8x32xf32>, vector<32x128xf32>, vector<8x128xf32> -> vector<8x128xf32>
    %124 = arith.addf %119, %123 : vector<8x128xf32>
    %125 = vector.extract_strided_slice %94 {offsets = [32, 0], sizes = [8, 32], strides = [1, 1]} : vector<40x32xf32> to vector<8x32xf32>
    %c4 = arith.constant 4 : index
    %c0_43 = arith.constant 0 : index
    %c0_44 = arith.constant 0 : index
    %126 = vector.load %arg5[%c4, %c0_43, %c0_44] : memref<5x32x128xf32, #tpu.memory_space<vmem>>, vector<1x32x128xf32>
    %127 = vector.shape_cast %126 : vector<1x32x128xf32> to vector<32x128xf32>
    %cst_45 = arith.constant dense<0.000000e+00> : vector<8x128xf32>
    %128 = tpu.matmul %125, %127, %cst_45 {dimension_numbers = #tpu.dot_dimension_numbers<[1], [0], [0], [1], [0, 0, 1, 1], [], []>} : vector<8x32xf32>, vector<32x128xf32>, vector<8x128xf32> -> vector<8x128xf32>
    %129 = arith.addf %124, %128 : vector<8x128xf32>
    %c0_46 = arith.constant 0 : index
    %c0_47 = arith.constant 0 : index
    %130 = vector.load %arg8[%c0_46, %c0_47] : memref<8x128xf32, #tpu.memory_space<vmem>>, vector<8x128xf32>
    tpu.vector_store %arg8[%c0_46, %c0_47], %129 {strides = array<i32>} : memref<8x128xf32, #tpu.memory_space<vmem>>, vector<8x128xf32>,
    return
  }
}

</mosaic_0001>

<bundles_post_ra>
// kernel: bert_classifier_forward.1
= control target key start
LH: loop header
LB: loop body
LE: loop exit
PB: predicated region body
PF: predicated region fallthrough
CT: control target
= control target key end

     0   :  { %vm42_vm0 = vcmask 64512   ;;  %v982_v3 = vmov 0   ;;  %v983_v4 = vmov 4   ;;  %v984_v13 = vmov 1   ;;  %s1515_s1 = inlined_call_operand.vmem [shape: f32[40,8], index: 1, kind: input, shape index: {}]   ;;  %s1516_s0 = inlined_call_operand.vmem [shape: s32[40,8], index: 0, kind: input, shape index: {}]   ;;  %s1517_s3 = inlined_call_operand.vmem [shape: f32[128,32], index: 3, kind: input, shape index: {}]   ;;  %s1518_s7 = inlined_call_operand.vmem [shape: f32[8,128], index: 7, kind: input, shape index: {}]   ;;  %s1519_s4 = inlined_call_operand.vmem [shape: f32[32,32], index: 4, kind: input, shape index: {}]   ;;  %s1520_s2 = inlined_call_operand.vmem [shape: s32[8,1], index: 2, kind: input, shape index: {}]   ;;  %s1521_s5 = inlined_call_operand.vmem [shape: f32[5,32,128], index: 5, kind: input, shape index: {}]   ;;  %s1522_s6 = inlined_call_operand.vmem [shape: f32[16,128], index: 6, kind: input, shape index: {}]   ;;  %s1523_s8 = inlined_call_operand.vmem [shape: f32[8,128], index: 8, kind: output, shape index: {}]  }
   0x1   :  { %v1039_v0 = vld [vmem:[%s1515_s1 + $0x20] sm:$0xff]  ;;  %v1044_v1 = vld [vmem:[%s1515_s1 + $0x10] sm:$0xff]  ;;  %883 = vset.pattern.permute.xlu2 %v982_v3  ;;  %890 = vset.pattern.permute.xlu0 %v983_v4  ;;  %v1063_v8 = vld [vmem:[%s1515_s1 + $0x18] sm:$0xff]  ;;  %v985_v15 = vmov 6   ;;  %v986_v16 = vmov 2   ;;  %v987_v17 = vmov 3   ;;  %v63_v48 = vlaneseq }
   0x2   :  { %v1049_v2 = vld [vmem:[%s1515_s1] sm:$0xff]  ;;  %v55_v5 = vsel %vm42_vm0, %v1039_v0, 0.0  ;;  %v49_v6 = vsel %vm42_vm0, %v1044_v1, 0.0  ;;  %884 = vset.pattern.permute.xlu1 %v982_v3  ;;  %v1068_v9 = vld [vmem:[%s1515_s1 + $0x8] sm:$0xff]  ;;  %v52_v10 = vsel %vm42_vm0, %v1063_v8, 0.0  ;;  %v1097_v18 = vld [vmem:[%s1516_s0 + $0x18] sm:$0xff] }
   0x3   :  { %v43_v7 = vsel %vm42_vm0, %v1049_v2, 0.0  ;;  %56 = vadd.xlane.f32.xlu2 %v55_v5  ;;  %50 = vadd.xlane.f32.xlu1 %v49_v6  ;;  %v46_v11 = vsel %vm42_vm0, %v1068_v9, 0.0  ;;  %v29_v12 = vld [vmem:[%s1516_s0] sm:$0xff]  ;;  %v1083_v14 = vld [vmem:[%s1516_s0 + $0x8] sm:$0xff]  ;;  %v988_v19 = vmov 5   ;;  %v989_v20 = vmov 7  }
   0x4   :  { %44 = vadd.xlane.f32.xlu0 %v43_v7  ;;  %v1120_v21 = vld [vmem:[%s1516_s0 + $0x10] sm:$0xff]  ;;  %v1134_v22 = vld [vmem:[%s1516_s0 + $0x20] sm:$0xff]  ;;  %v485_v32 = vld [vmem:[%s1517_s3 + $0x78] sm:$0xff]  ;;  %v1235_v53 = vand.u32 127, %v63_v48 }
   0x5   :  { %v484_v33 = vld [vmem:[%s1517_s3 + $0x70] sm:$0xff]  ;;  %486 = vmatpush.msra.mxu0 %v485_v32  ;;  %v483_v34 = vld [vmem:[%s1517_s3 + $0x68] sm:$0xff]  ;;  %v482_v37 = vld [vmem:[%s1517_s3 + $0x60] sm:$0xff] }
   0x6   :  { %v481_v39 = vld [vmem:[%s1517_s3 + $0x58] sm:$0xff]  ;;  %v480_v40 = vld [vmem:[%s1517_s3 + $0x50] sm:$0xff]  ;;  %v479_v42 = vld [vmem:[%s1517_s3 + $0x48] sm:$0xff] }
   0x7   :  { %487 = vmatpush.msra.mxu0 %v484_v33  ;;  %v478_v44 = vld [vmem:[%s1517_s3 + $0x40] sm:$0xff]  ;;  %v477_v45 = vld [vmem:[%s1517_s3 + $0x38] sm:$0xff]  ;;  %v476_v47 = vld [vmem:[%s1517_s3 + $0x30] sm:$0xff] }
   0x8   :  { %v475_v50 = vld [vmem:[%s1517_s3 + $0x28] sm:$0xff]  ;;  %v474_v52 = vld [vmem:[%s1517_s3 + $0x20] sm:$0xff]  ;;  %v473_v54 = vld [vmem:[%s1517_s3 + $0x18] sm:$0xff] }
   0x9   :  { %488 = vmatpush.msra.mxu0 %v483_v34  ;;  %v472_v56 = vld [vmem:[%s1517_s3 + $0x10] sm:$0xff]  ;;  %v471_v59 = vld [vmem:[%s1517_s3 + $0x8] sm:$0xff]  ;;  %v470_v61 = vld [vmem:[%s1517_s3] sm:$0xff] }
   0xb   :  { %53 = vadd.xlane.f32.xlu1 %v52_v10  ;;  %489 = vmatpush.msra.mxu0 %v482_v37 }
   0xc   :  { %47 = vadd.xlane.f32.xlu0 %v46_v11 }
   0xd   :  { %490 = vmatpush.msra.mxu0 %v481_v39 }
   0xf   :  { %491 = vmatpush.msra.mxu0 %v480_v40 }
  0x11   :  { %492 = vmatpush.msra.mxu0 %v479_v42 }
  0x13   :  { %493 = vmatpush.msra.mxu0 %v478_v44 }
  0x15   :  { %494 = vmatpush.msra.mxu0 %v477_v45 }
  0x17   :  { %495 = vmatpush.msra.mxu0 %v476_v47 }
  0x19   :  { %496 = vmatpush.msra.mxu0 %v475_v50 }
  0x1b   :  { %66 = vperm.xlu2 %883, %v29_v12   ;;  %497 = vmatpush.msra.mxu0 %v474_v52 }
  0x1d   :  { %498 = vmatpush.msra.mxu0 %v473_v54 }
  0x1f   :  { %499 = vmatpush.msra.mxu0 %v472_v56 }
  0x20   :  { %271 = vperm.xlu0 %890, %v29_v12  }
  0x21   :  { %500 = vmatpush.msra.mxu0 %v471_v59 }
  0x23   :  { %885 = vset.pattern.permute.xlu2 %v984_v13  ;;  %501 = vmatpush.msra.mxu0 %v470_v61 }
  0x24   :  { %87 = vperm.xlu1 %884, %v1049_v2   ;;  %141 = vperm.xlu2 %885, %v1049_v2  }
  0x28   :  { %906 = vset.pattern.permute.xlu0 %v985_v15 }
  0x29   :  { %374 = vperm.xlu0 %906, %v1083_v14  }
  0x2c   :  { %887 = vset.pattern.permute.xlu1 %v986_v16  ;;  %886 = vset.pattern.permute.xlu2 %v986_v16 }
  0x2d   :  { %191 = vperm.xlu1 %887, %v1049_v2   ;;  %171 = vperm.xlu2 %886, %v29_v12  }
  0x31   :  { %907 = vset.pattern.permute.xlu0 %v984_v13 }
  0x32   :  { %121 = vperm.xlu0 %907, %v29_v12  }
  0x35   :  { %889 = vset.pattern.permute.xlu1 %v987_v17  ;;  %888 = vset.pattern.permute.xlu2 %v987_v17 }
  0x36   :  { %241 = vperm.xlu1 %889, %v1049_v2   ;;  %221 = vperm.xlu2 %888, %v29_v12  }
  0x3a   :  { %130 = vperm.xlu0 %907, %v1097_v18  }
  0x3e   :  { %892 = vset.pattern.permute.xlu1 %v982_v3  ;;  %891 = vset.pattern.permute.xlu2 %v983_v4 }
  0x3f   :  { %69 = vperm.xlu1 %892, %v1083_v14   ;;  %291 = vperm.xlu2 %891, %v1049_v2  }
  0x42   :  { %916 = vset.pattern.permute.xlu0 %v986_v16 }
  0x43   :  { %195 = vperm.xlu0 %916, %v1068_v9  }
  0x47   :  { %894 = vset.pattern.permute.xlu1 %v988_v19  ;;  %893 = vset.pattern.permute.xlu2 %v984_v13 }
  0x48   :  { %321 = vperm.xlu1 %894, %v29_v12   ;;  %124 = vperm.xlu2 %893, %v1083_v14  }
  0x4b   :  { %180 = vperm.xlu0 %916, %v1097_v18  }
  0x50   :  { %341 = vperm.xlu1 %894, %v1049_v2   ;;  %145 = vperm.xlu2 %893, %v1068_v9  }
  0x53   :  { %920 = vset.pattern.permute.xlu0 %v989_v20 }
  0x54   :  { %441 = vperm.xlu0 %920, %v1049_v2  }
  0x58   :  { %896 = vset.pattern.permute.xlu1 %v985_v15  ;;  %895 = vset.pattern.permute.xlu2 %v986_v16 }
  0x59   :  { %371 = vperm.xlu1 %896, %v29_v12   ;;  %174 = vperm.xlu2 %895, %v1083_v14  }
  0x5c   :  { %427 = vperm.xlu0 %920, %v1120_v21  }
  0x61   :  { %898 = vset.pattern.permute.xlu1 %v987_v17  ;;  %897 = vset.pattern.permute.xlu2 %v985_v15 }
  0x62   :  { %224 = vperm.xlu1 %898, %v1083_v14   ;;  %391 = vperm.xlu2 %897, %v1049_v2  }
  0x64   :  { %924 = vset.pattern.permute.xlu0 %v982_v3 }
  0x65   :  { %92 = vperm.xlu0 %924, %v1068_v9  }
  0x6a   :  { %245 = vperm.xlu1 %898, %v1068_v9   ;;  %899 = vset.pattern.permute.xlu2 %v989_v20 }
  0x6b   :  { %421 = vperm.xlu2 %899, %v29_v12  }
  0x6d   :  { %78 = vperm.xlu0 %924, %v1134_v22  }
  0x72   :  { %901 = vset.pattern.permute.xlu1 %v983_v4 }
  0x73   :  { %295 = vperm.xlu1 %901, %v1068_v9   ;;  %900 = vset.pattern.permute.xlu2 %v983_v4 }
  0x74   :  { %274 = vperm.xlu2 %900, %v1083_v14  }
  0x75   :  { %929 = vset.pattern.permute.xlu0 %v988_v19 }
  0x76   :  { %324 = vperm.xlu0 %929, %v1083_v14   ;;  %v1143_v23 = vpop.xlane.xlu2 %56  ;;  %v1154_v26 = vpop.xlane.xlu1 %50 }
  0x77   :  { %v1151_v25 = vpop.xlane.xlu0 %44 }
  0x7b   :  { %903 = vset.pattern.permute.xlu1 %v984_v13 }
  0x7c   :  { %127 = vperm.xlu1 %903, %v1120_v21   ;;  %902 = vset.pattern.permute.xlu2 %v982_v3 }
  0x7d   :  { %72 = vperm.xlu2 %902, %v1120_v21  }
  0x7e   :  { %v1149_v24 = vpop.permute.xlu2 %66  ;;  %353 = vperm.xlu0 %929, %v1063_v8   ;;  %v1167_v29 = vpop.xlane.xlu1 %53 }
  0x7f   :  { %v1162_v28 = vpop.xlane.xlu0 %47  ;;  %vm80_vm4 = vcmp.eq.s32.totalorder %v1235_v53, %v1149_v24 }
  0x84   :  { %149 = vperm.xlu1 %903, %v1044_v1  }
  0x85   :  { %97 = vperm.xlu2 %902, %v1044_v1  }
  0x86   :  { %v1158_v27 = vpop.permute.xlu2 %141  ;;  %934 = vset.pattern.permute.xlu0 %v987_v17 }
  0x87   :  { %249 = vperm.xlu0 %934, %v1044_v1  }
  0x8c   :  { %905 = vset.pattern.permute.xlu1 %v986_v16 }
  0x8d   :  { %177 = vperm.xlu1 %905, %v1120_v21   ;;  %904 = vset.pattern.permute.xlu2 %v988_v19 }
  0x8e   :  { %345 = vperm.xlu2 %904, %v1068_v9   ;;  %v1170_v30 = vpop.permute.xlu2 %171 }
  0x8f   :  { %233 = vperm.xlu0 %934, %v1134_v22   ;;  %vm185_vm5 = vcmp.eq.s32.totalorder %v1235_v53, %v1170_v30 }
  0x92   :  { %v1173_v31 = vpop.permute.xlu0 %271 }
  0x93   :  { %vm285_vm7 = vcmp.eq.s32.totalorder %v1235_v53, %v1173_v31 }
  0x95   :  { %909 = vset.pattern.permute.xlu1 %v985_v15 }
  0x96   :  { %v1185_v35 = vpop.permute.xlu1 %87  ;;  %395 = vperm.xlu1 %909, %v1068_v9   ;;  %v1188_v36 = vpop.permute.xlu2 %221  ;;  %908 = vset.pattern.permute.xlu2 %v986_v16 }
  0x97   :  { %199 = vperm.xlu2 %908, %v1044_v1   ;;  %940 = vset.pattern.permute.xlu0 %v983_v4  ;;  %v110_v7 = vsel %vm80_vm4, %v1185_v35, 0.0  ;;  %vm235_vm6 = vcmp.eq.s32.totalorder %v1235_v53, %v1188_v36 }
  0x98   :  { %307 = vperm.xlu0 %940, %v1039_v0  }
  0x9b   :  { %v1197_v38 = vpop.permute.xlu0 %374 }
  0x9e   :  { %911 = vset.pattern.permute.xlu1 %v989_v20  ;;  %v1206_v41 = vpop.permute.xlu2 %291 }
  0x9f   :  { %v192_v43 = vpop.permute.xlu1 %191  ;;  %424 = vperm.xlu1 %911, %v1083_v14   ;;  %910 = vset.pattern.permute.xlu2 %v987_v17  ;;  %v310_v34 = vsel %vm285_vm7, %v1206_v41, 0.0 }
  0xa0   :  { %227 = vperm.xlu2 %910, %v1120_v21   ;;  %945 = vset.pattern.permute.xlu0 %v989_v20  ;;  %v210_v12 = vsel %vm185_vm5, %v192_v43, 0.0 }
  0xa1   :  { %433 = vperm.xlu0 %945, %v1134_v22  }
  0xa4   :  { %v122_v46 = vpop.permute.xlu0 %121 }
  0xa5   :  { %vm135_vm3 = vcmp.eq.s32.totalorder %v1235_v53, %v122_v46 }
  0xa6   :  { %v125_v49 = vpop.permute.xlu2 %124  ;;  %v160_v6 = vsel %vm135_vm3, %v1158_v27, 0.0 }
  0xa7   :  { %913 = vset.pattern.permute.xlu1 %v983_v4  ;;  %vm136_vm1 = vcmp.eq.s32.totalorder %v1235_v53, %v125_v49  ;;  %v165_v10 = vadd.f32 %v160_v6, %v110_v7 }
  0xa8   :  { %v242_v51 = vpop.permute.xlu1 %241  ;;  %277 = vperm.xlu1 %913, %v1120_v21   ;;  %912 = vset.pattern.permute.xlu2 %v989_v20 }
  0xa9   :  { %445 = vperm.xlu2 %912, %v1068_v9   ;;  %948 = vset.pattern.permute.xlu0 %v982_v3  ;;  %v215_v14 = vadd.f32 %v210_v12, %v165_v10  ;;  %v260_v24 = vsel %vm235_vm6, %v242_v51, 0.0 }
  0xab   :  { %v265_v32 = vadd.f32 %v260_v24, %v215_v14 }
  0xac   :  { %v1242_v55 = vpop.permute.xlu0 %130 }
  0xad   :  { %v315_v36 = vadd.f32 %v310_v34, %v265_v32  ;;  %vm138_vm4 = vcmp.eq.s32.totalorder %v1235_v53, %v1242_v55 }
  0xae   :  { %v146_v57 = vpop.permute.xlu2 %145 }
  0xaf   :  { %v1247_v58 = vsel %vm136_vm1, %v146_v57, 0.0 }
  0xb0   :  { %915 = vset.pattern.permute.xlu1 %v982_v3 }
  0xb1   :  { %v1253_v60 = vpop.permute.xlu1 %69  ;;  %75 = vperm.xlu1 %915, %v1097_v18   ;;  %914 = vset.pattern.permute.xlu2 %v983_v4 }
  0xb2   :  { %299 = vperm.xlu2 %914, %v1044_v1   ;;  %vm81_vm11 = vcmp.eq.s32.totalorder %v1235_v53, %v1253_v60 }
  0xb5   :  { %v196_v62 = vpop.permute.xlu0 %195 }
  0xb6   :  { %v175_v63 = vpop.permute.xlu2 %174 }
  0xb7   :  { %vm186_vm2 = vcmp.eq.s32.totalorder %v1235_v53, %v175_v63 }
  0xb8   :  { %v211_v2 = vsel %vm186_vm2, %v196_v62, 0.0  ;;  %vm386_vm2 = vcmp.eq.s32.totalorder %v1235_v53, %v1197_v38 }
  0xb9   :  { %102 = vperm.xlu1 %915, %v1063_v8  }
  0xba   :  { %v322_v5 = vpop.permute.xlu1 %321  ;;  %917 = vset.pattern.permute.xlu2 %v988_v19 }
  0xbb   :  { %327 = vperm.xlu2 %917, %v1120_v21   ;;  %vm335_vm8 = vcmp.eq.s32.totalorder %v1235_v53, %v322_v5 }
  0xbd   :  { %v1270_v9 = vpop.permute.xlu0 %180 }
  0xbe   :  { %v392_v11 = vpop.permute.xlu2 %391  ;;  %vm188_vm6 = vcmp.eq.s32.totalorder %v1235_v53, %v1270_v9 }
  0xc1   :  { %919 = vset.pattern.permute.xlu1 %v988_v19 }
  0xc2   :  { %349 = vperm.xlu1 %919, %v1044_v1   ;;  %v342_v27 = vpop.permute.xlu1 %341 }
  0xc3   :  { %918 = vset.pattern.permute.xlu2 %v984_v13  ;;  %v360_v35 = vsel %vm335_vm8, %v342_v27, 0.0 }
  0xc4   :  { %153 = vperm.xlu2 %918, %v1063_v8   ;;  %v365_v39 = vadd.f32 %v360_v35, %v315_v36 }
  0xc6   :  { %v442_v30 = vpop.permute.xlu0 %441  ;;  %v422_v33 = vpop.permute.xlu2 %421 }
  0xc7   :  { %vm435_vm9 = vcmp.eq.s32.totalorder %v1235_v53, %v422_v33 }
  0xc8   :  { %v460_v31 = vsel %vm435_vm9, %v442_v30, 0.0 }
  0xca   :  { %922 = vset.pattern.permute.xlu1 %v986_v16 }
  0xcb   :  { %203 = vperm.xlu1 %922, %v1063_v8   ;;  %v372_v37 = vpop.permute.xlu1 %371 }
  0xcc   :  { %vm385_vm10 = vcmp.eq.s32.totalorder %v1235_v53, %v372_v37  ;;  %921 = vset.pattern.permute.xlu2 %v985_v15 }
  0xcd   :  { %v410_v40 = vsel %vm385_vm10, %v392_v11, 0.0  ;;  %377 = vperm.xlu2 %921, %v1120_v21  }
  0xce   :  { %v415_v41 = vadd.f32 %v410_v40, %v365_v39  ;;  %v1290_v42 = vpop.permute.xlu0 %427  ;;  %v275_v43 = vpop.permute.xlu2 %274 }
  0xcf   :  { %vm286_vm15 = vcmp.eq.s32.totalorder %v1235_v53, %v275_v43  ;;  %v606_v43 = vld [vmem:[%s1519_s4 + $0x10] sm:$0xff] }
  0xd0   :  { %v465_v44 = vadd.f32 %v460_v31, %v415_v41  ;;  %v607_v41 = vld [vmem:[%s1519_s4 + $0x18] sm:$0xff] }
  0xd1   :  { %637 = vmatpush.msra.mxu1 %v607_v41 }
  0xd2   :  { %502 = vmatmul.f32.vlgmr.msra.gmra.mxu0 %v465_v44 }
  0xd3   :  { %923 = vset.pattern.permute.xlu1 %v987_v17  ;;  %638 = vmatpush.msra.mxu1 %v606_v43 }
  0xd4   :  { %230 = vperm.xlu1 %923, %v1097_v18   ;;  %v225_v45 = vpop.permute.xlu1 %224 }
  0xd5   :  { %399 = vperm.xlu2 %921, %v1044_v1   ;;  %vm236_vm14 = vcmp.eq.s32.totalorder %v1235_v53, %v225_v45 }
  0xd7   :  { %v93_v46 = vpop.permute.xlu0 %92  ;;  %v73_v47 = vpop.permute.xlu2 %72 }
  0xd8   :  { %v111_v48 = vsel %vm81_vm11, %v93_v46, 0.0  ;;  %vm82_vm12 = vcmp.eq.s32.totalorder %v1235_v53, %v73_v47 }
  0xd9   :  { %v166_v21 = vadd.f32 %v1247_v58, %v111_v48 }
  0xdb   :  { %v216_v49 = vadd.f32 %v211_v2, %v166_v21 }
  0xdc   :  { %926 = vset.pattern.permute.xlu1 %v989_v20  ;;  %v246_v50 = vpop.permute.xlu1 %245 }
  0xdd   :  { %449 = vperm.xlu1 %926, %v1044_v1   ;;  %925 = vset.pattern.permute.xlu2 %v987_v17  ;;  %v261_v63 = vsel %vm236_vm14, %v246_v50, 0.0 }
  0xde   :  { %253 = vperm.xlu2 %925, %v1063_v8   ;;  %v266_v7 = vadd.f32 %v261_v63, %v216_v49  ;;  %v662_v63 = vld [vmem:[%s1520_s2] sm:$0xff] }
  0xdf   :  { %v98_v51 = vpop.permute.xlu2 %97  ;;  %v1311_v58 = vpop.permute.xlu0 %78 }
  0xe0   :  { %v112_v52 = vsel %vm82_vm12, %v98_v51, 0.0 }
  0xe5   :  { %928 = vset.pattern.permute.xlu1 %v983_v4  ;;  %v296_v54 = vpop.permute.xlu1 %295 }
  0xe6   :  { %303 = vperm.xlu1 %928, %v1063_v8   ;;  %927 = vset.pattern.permute.xlu2 %v983_v4 }
  0xe7   :  { %280 = vperm.xlu2 %927, %v1097_v18  }
  0xe8   :  { %v346_v56 = vpop.permute.xlu2 %345  ;;  %v325_v2 = vpop.permute.xlu0 %324 }
  0xe9   :  { %vm336_vm1 = vcmp.eq.s32.totalorder %v1235_v53, %v325_v2 }
  0xea   :  { %v361_v14 = vsel %vm336_vm1, %v346_v56, 0.0 }
  0xee   :  { %931 = vset.pattern.permute.xlu1 %v988_v19  ;;  %v128_v57 = vpop.permute.xlu1 %127 }
  0xef   :  { %330 = vperm.xlu1 %931, %v1097_v18   ;;  %930 = vset.pattern.permute.xlu2 %v984_v13  ;;  %vm137_vm13 = vcmp.eq.s32.totalorder %v1235_v53, %v128_v57 }
  0xf0   :  { %133 = vperm.xlu2 %930, %v1134_v22  }
  0xf1   :  { %v200_v1 = vpop.permute.xlu2 %199 }
  0xf6   :  { %v150_v59 = vpop.permute.xlu1 %149 }
  0xf7   :  { %v162_v60 = vsel %vm137_vm13, %v150_v59, 0.0  ;;  %933 = vset.pattern.permute.xlu1 %v984_v13  ;;  %v311_v13 = vsel %vm286_vm15, %v296_v54, 0.0  ;;  %vm437_vm15 = vcmp.eq.s32.totalorder %v1235_v53, %v1290_v42 }
  0xf8   :  { %v167_v61 = vadd.f32 %v162_v60, %v112_v52  ;;  %157 = vperm.xlu1 %933, %v1039_v0   ;;  %932 = vset.pattern.permute.xlu2 %v982_v3  ;;  %v316_v12 = vadd.f32 %v311_v13, %v266_v7  ;;  %v1394_v13 = vld [vmem:[%s1518_s7] ss:$0 sm:$0xff] }
  0xf9   :  { %107 = vperm.xlu2 %932, %v1039_v0  }
  0xfa   :  { %v1318_v62 = vpop.permute.xlu2 %227  ;;  %v366_v27 = vadd.f32 %v361_v14, %v316_v12 }
  0xfb   :  { %vm237_vm7 = vcmp.eq.s32.totalorder %v1235_v53, %v1318_v62 }
  0xff   :  { %v178_v5 = vpop.permute.xlu1 %177 }
 0x100   :  { %vm187_vm0 = vcmp.eq.s32.totalorder %v1235_v53, %v178_v5  ;;  %936 = vset.pattern.permute.xlu1 %v985_v15 }
 0x101   :  { %v212_v6 = vsel %vm187_vm0, %v200_v1, 0.0  ;;  %380 = vperm.xlu1 %936, %v1097_v18   ;;  %935 = vset.pattern.permute.xlu2 %v986_v16  ;;  %vm609_vm0 = vcmask 261120  }
 0x102   :  { %v1327_v10 = vadd.f32 %v212_v6, %v167_v61  ;;  %183 = vperm.xlu2 %935, %v1134_v22  }
 0x103   :  { %v446_v11 = vpop.permute.xlu2 %445 }
 0x108   :  { %v396_v24 = vpop.permute.xlu1 %395 }
 0x109   :  { %v411_v32 = vsel %vm386_vm2, %v396_v24, 0.0  ;;  %403 = vperm.xlu1 %936, %v1063_v8  }
 0x10a   :  { %v416_v30 = vadd.f32 %v411_v32, %v366_v27  ;;  %207 = vperm.xlu2 %935, %v1039_v0  }
 0x10c   :  { %v1334_v16 = vpop.permute.xlu2 %299 }
 0x111   :  { %938 = vset.pattern.permute.xlu1 %v987_v17  ;;  %v425_v33 = vpop.permute.xlu1 %424 }
 0x112   :  { %vm436_vm3 = vcmp.eq.s32.totalorder %v1235_v53, %v425_v33  ;;  %257 = vperm.xlu1 %938, %v1039_v0   ;;  %937 = vset.pattern.permute.xlu2 %v989_v20 }
 0x113   :  { %v461_v38 = vsel %vm436_vm3, %v446_v11, 0.0  ;;  %430 = vperm.xlu2 %937, %v1097_v18  }
 0x114   :  { %v466_v34 = vadd.f32 %v461_v38, %v416_v30 }
 0x115   :  { %v328_v35 = vpop.permute.xlu2 %327 }
 0x116   :  { %505 = vmatmul.f32.gmra.mxu0 %v466_v34  ;;  %vm337_vm11 = vcmp.eq.s32.totalorder %v1235_v53, %v328_v35 }
 0x11a   :  { %939 = vset.pattern.permute.xlu1 %v983_v4  ;;  %v278_v36 = vpop.permute.xlu1 %277 }
 0x11b   :  { %283 = vperm.xlu1 %939, %v1134_v22   ;;  %453 = vperm.xlu2 %937, %v1063_v8   ;;  %vm287_vm8 = vcmp.eq.s32.totalorder %v1235_v53, %v278_v36  ;;  %v59_v36 = vmax.f32 %v1162_v28, 1.0 }
 0x11c   :  { %v312_v51 = vsel %vm287_vm8, %v1334_v16, 0.0 }
 0x11e   :  { %v154_v17 = vpop.permute.xlu2 %153 }
 0x11f   :  { %v163_v37 = vsel %vm138_vm4, %v154_v17, 0.0 }
 0x123   :  { %942 = vset.pattern.permute.xlu1 %v988_v19  ;;  %v76_v39 = vpop.permute.xlu1 %75  ;;  %941 = vset.pattern.permute.xlu2 %v988_v19  ;;  %v58_v19 = vmax.f32 %v1151_v25, 1.0 }
 0x124   :  { %357 = vperm.xlu1 %942, %v1039_v0   ;;  %333 = vperm.xlu2 %941, %v1134_v22   ;;  %vm83_vm5 = vcmp.eq.s32.totalorder %v1235_v53, %v76_v39 }
 0x125   :  { %952 = vrcp.f32 %v58_v19  ;;  %vm523_vm9 = vweird.f32 %v58_v19  ;;  %v529_v54 = vand.u32 2147483648, %v58_v19  ;;  %v527_v1 = vand.u32 2147483647, %v58_v19 }
 0x127   :  { %v378_v4 = vpop.permute.xlu2 %377  ;;  %v530_v62 = vor.u32 1.1754944e-38, %v529_v54  ;;  %vm528_vm14 = vcmp.eq.f32.partialorder %v527_v1, 8.507059e+37 }
 0x128   :  { %vm387_vm12 = vcmp.eq.s32.totalorder %v1235_v53, %v378_v4 }
 0x12b   :  { %v103_v18 = vpop.permute.xlu1 %102  ;;  %v953_v44 = vpop.eup %952 }
 0x12c   :  { %v113_v31 = vsel %vm83_vm5, %v103_v18, 0.0  ;;  %944 = vset.pattern.permute.xlu1 %v985_v15  ;;  %943 = vset.pattern.permute.xlu2 %v985_v15  ;;  %v605_v15 = vld [vmem:[%s1519_s4 + $0x8] sm:$0xff]  ;;  %vm524_vm10 = vweird.f32 %v953_v44 }
 0x12d   :  { %v168_v8 = vadd.f32 %v163_v37, %v113_v31  ;;  %407 = vperm.xlu1 %944, %v1039_v0   ;;  %383 = vperm.xlu2 %943, %v1134_v22   ;;  %v1368_v22 = vpop.permute.xlu0 %353  ;;  %vm525_vm13 = vmor %vm523_vm9, %vm524_vm10  ;;  %vm84_vm10 = vcmp.eq.s32.totalorder %v1235_v53, %v1311_v58 }
 0x12e   :  { %639 = vmatpush.msra.mxu1 %v605_v15 }
 0x12f   :  { %v400_v55 = vpop.permute.xlu2 %399 }
 0x130   :  { %v412_v2 = vsel %vm387_vm12, %v400_v55, 0.0 }
 0x134   :  { %v350_v40 = vpop.permute.xlu1 %349 }
 0x135   :  { %946 = vset.pattern.permute.xlu2 %v989_v20  ;;  %947 = vset.pattern.permute.xlu1 %v982_v3  ;;  %v604_v20 = vld [vmem:[%s1519_s4] sm:$0xff]  ;;  %v250_v48 = vpop.permute.xlu0 %249  ;;  %v362_v56 = vsel %vm337_vm11, %v350_v40, 0.0 }
 0x136   :  { %457 = vperm.xlu2 %946, %v1039_v0   ;;  %640 = vmatpush.msra.mxu1 %v604_v20  ;;  %v519_v0 = vmul.f32 %v953_v44, %v58_v19  ;;  %v262_v49 = vsel %vm237_vm7, %v250_v48, 0.0 }
 0x137   :  { %v267_v9 = vadd.f32 %v262_v49, %v1327_v10  ;;  %664 = vperm.xlu1 %947, %v662_v63  }
 0x138   :  { %v1370_v25 = vpop.permute.xlu2 %253  ;;  %v520_v3 = vsub.f32 1.0, %v519_v0 }
 0x139   :  { %v317_v59 = vadd.f32 %v312_v51, %v267_v9 }
 0x13a   :  { %v521_v50 = vmul.f32 %v953_v44, %v520_v3  ;;  %v542_v3 = vand.u32 2147483647, %v59_v36 }
 0x13b   :  { %v367_v61 = vadd.f32 %v362_v56, %v317_v59 }
 0x13c   :  { %v522_v57 = vadd.f32 %v953_v44, %v521_v50  ;;  %vm543_vm9 = vcmp.eq.f32.partialorder %v542_v3, 8.507059e+37 }
 0x13d   :  { %v204_v45 = vpop.permute.xlu1 %203  ;;  %v417_v6 = vadd.f32 %v412_v2, %v367_v61 }
 0x13e   :  { %v213_v46 = vsel %vm188_vm6, %v204_v45, 0.0  ;;  %v526_v5 = vsel %vm525_vm13, %v953_v44, %v522_v57  ;;  %vm538_vm6 = vweird.f32 %v59_v36 }
 0x13f   :  { %v218_v47 = vadd.f32 %v213_v46, %v168_v8  ;;  %v531_v11 = vsel %vm528_vm14, %v530_v62, %v526_v5  ;;  %v544_v46 = vand.u32 2147483648, %v59_v36 }
 0x141   :  { %v281_v21 = vpop.permute.xlu2 %280 }
 0x142   :  { %vm288_vm2 = vcmp.eq.s32.totalorder %v1235_v53, %v281_v21  ;;  %v545_v21 = vor.u32 1.1754944e-38, %v544_v46 }
 0x146   :  { %v231_v52 = vpop.permute.xlu1 %230 }
 0x147   :  { %vm238_vm1 = vcmp.eq.s32.totalorder %v1235_v53, %v231_v52 }
 0x148   :  { %v263_v37 = vsel %vm238_vm1, %v1370_v25, 0.0 }
 0x149   :  { %v268_v4 = vadd.f32 %v263_v37, %v218_v47  ;;  %v697_v37 = vld [vmem:[%s1521_s5] sm:$0xff] }
 0x14a   :  { %v1384_v60 = vpop.permute.xlu2 %133 }
 0x14b   :  { %vm139_vm11 = vcmp.eq.s32.totalorder %v1235_v53, %v1384_v60 }
 0x14f   :  { %v450_v7 = vpop.permute.xlu1 %449  ;;  %v503_v10 = vpop.f32.mrf.mxu0 }
 0x150   :  { %v462_v12 = vsel %vm437_vm15, %v450_v7, 0.0  ;;  %v532_v14 = vmul.f32 %v531_v11, %v503_v10 }
 0x151   :  { %v467_v27 = vadd.f32 %v462_v12, %v417_v6 }
 0x152   :  { %v594_v24 = vadd.f32 %v1394_v13, %v532_v14 }
 0x153   :  { %508 = vmatmul.f32.gmra.mxu0 %v467_v27  ;;  %v108_v32 = vpop.permute.xlu2 %107 }
 0x154   :  { %954 = vtanh.f32 %v594_v24  ;;  %v114_v56 = vsel %vm84_vm10, %v108_v32, 0.0 }
 0x155   :  { %956 = vrcp.f32 %v59_v36 }
 0x158   :  { %v304_v30 = vpop.permute.xlu1 %303 }
 0x159   :  { %v313_v39 = vsel %vm288_vm2, %v304_v30, 0.0 }
 0x15a   :  { %v955_v42 = vpop.eup %954  ;;  %v318_v31 = vadd.f32 %v313_v39, %v268_v4  ;;  %v990_v39 = vmov 0.0  }
 0x15b   :  { %846 = vmatmul.msk.f32.vlgmr.msra.gmra.mxu1 %vm609_vm0, %v955_v42  ;;  %v957_v41 = vpop.eup %956  ;;  %v60_v42 = vmax.f32 %v1154_v26, 1.0 }
 0x15c   :  { %v184_v16 = vpop.permute.xlu2 %183  ;;  %v534_v25 = vmul.f32 %v957_v41, %v59_v36  ;;  %vm539_vm7 = vweird.f32 %v957_v41  ;;  %v698_v36 = vld [vmem:[%s1521_s5 + $0x8] sm:$0xff] }
 0x15d   :  { %vm540_vm8 = vmor %vm538_vm6, %vm539_vm7  ;;  %vm189_vm12 = vcmp.eq.s32.totalorder %v1235_v53, %v184_v16  ;;  %vm553_vm6 = vweird.f32 %v60_v42 }
 0x15e   :  { %v535_v20 = vsub.f32 1.0, %v534_v25  ;;  %v1442_v25 = vld [vmem:[%s1518_s7 + $0x1] ss:$0 sm:$0xff] }
 0x160   :  { %v536_v0 = vmul.f32 %v957_v41, %v535_v20 }
 0x161   :  { %v331_v33 = vpop.permute.xlu1 %330 }
 0x162   :  { %vm338_vm3 = vcmp.eq.s32.totalorder %v1235_v53, %v331_v33  ;;  %v537_v47 = vadd.f32 %v957_v41, %v536_v0  ;;  %v700_v33 = vld [vmem:[%s1521_s5 + $0x18] sm:$0xff] }
 0x163   :  { %v363_v18 = vsel %vm338_vm3, %v1368_v22, 0.0  ;;  %v234_v22 = vpop.permute.xlu0 %233  ;;  %716 = vmatpush.msra.mxu3 %v700_v33  ;;  %vm671_vm3 = vcmask 130048   ;;  %v862_v33 = vld [vmem:[%s1521_s5 + $0x58] sm:$0xff] }
 0x164   :  { %v208_v38 = vpop.permute.xlu2 %207  ;;  %v368_v19 = vadd.f32 %v363_v18, %v318_v31  ;;  %v541_v49 = vsel %vm540_vm8, %v957_v41, %v537_v47  ;;  %vm239_vm13 = vcmp.eq.s32.totalorder %v1235_v53, %v234_v22 }
 0x165   :  { %v546_v9 = vsel %vm543_vm9, %v545_v21, %v541_v49  ;;  %v214_v59 = vsel %vm189_vm12, %v208_v38, 0.0  ;;  %v670_v38 = vld [vmem:[%s1522_s6 + $0x8] sm:$0xff] }
 0x166   :  { %689 = vmatpush.msra.mxu2 %v670_v38  ;;  %v861_v38 = vld [vmem:[%s1521_s5 + $0x50] sm:$0xff] }
 0x16a   :  { %v158_v34 = vpop.permute.xlu1 %157 }
 0x16b   :  { %v164_v50 = vsel %vm139_vm11, %v158_v34, 0.0  ;;  %v308_v51 = vpop.permute.xlu0 %307  ;;  %v699_v34 = vld [vmem:[%s1521_s5 + $0x10] sm:$0xff] }
 0x16c   :  { %v169_v1 = vadd.f32 %v164_v50, %v114_v56  ;;  %717 = vmatpush.msra.mxu3 %v699_v34  ;;  %v857_v56 = vld [vmem:[%s1521_s5 + $0x38] sm:$0xff]  ;;  %v860_v34 = vld [vmem:[%s1521_s5 + $0x48] sm:$0xff] }
 0x16d   :  { %v431_v35 = vpop.permute.xlu2 %430 }
 0x16e   :  { %vm438_vm4 = vcmp.eq.s32.totalorder %v1235_v53, %v431_v35  ;;  %v219_v60 = vadd.f32 %v214_v59, %v169_v1  ;;  %v669_v35 = vld [vmem:[%s1522_s6] sm:$0xff]  ;;  %718 = vmatpush.msra.mxu3 %v698_v36  ;;  %v62_v59 = vmax.f32 %v1143_v23, 1.0 }
 0x16f   :  { %690 = vmatpush.msra.mxu2 %v669_v35 }
 0x170   :  { %719 = vmatpush.msra.mxu3 %v697_v37  ;;  %v866_v37 = vld [vmem:[%s1521_s5 + $0x70] sm:$0xff] }
 0x171   :  { %745 = vmatpush.msrb.mxu2 %v857_v56 }
 0x172   :  { %774 = vmatpush.msrb.mxu3 %v862_v33 }
 0x173   :  { %v381_v17 = vpop.permute.xlu1 %380  ;;  %v434_v2 = vpop.permute.xlu0 %433 }
 0x174   :  { %vm388_vm5 = vcmp.eq.s32.totalorder %v1235_v53, %v381_v17  ;;  %vm439_vm1 = vcmp.eq.s32.totalorder %v1235_v53, %v434_v2  ;;  %775 = vmatpush.msrb.mxu3 %v861_v38 }
 0x175   :  { %v454_v8 = vpop.permute.xlu2 %453 }
 0x176   :  { %v463_v40 = vsel %vm438_vm4, %v454_v8, 0.0  ;;  %776 = vmatpush.msrb.mxu3 %v860_v34 }
 0x17b   :  { %v404_v28 = vpop.permute.xlu1 %403 }
 0x17c   :  { %v413_v55 = vsel %vm388_vm5, %v404_v28, 0.0  ;;  %v557_v28 = vand.u32 2147483647, %v60_v42 }
 0x17d   :  { %v418_v43 = vadd.f32 %v413_v55, %v368_v19  ;;  %v559_v19 = vand.u32 2147483648, %v60_v42 }
 0x17e   :  { %v334_v45 = vpop.permute.xlu2 %333  ;;  %vm558_vm8 = vcmp.eq.f32.partialorder %v557_v28, 8.507059e+37 }
 0x17f   :  { %v468_v15 = vadd.f32 %v463_v40, %v418_v43  ;;  %vm339_vm15 = vcmp.eq.s32.totalorder %v1235_v53, %v334_v45  ;;  %v61_v45 = vmax.f32 %v1167_v29, 1.0 }
 0x181   :  { %511 = vmatmul.f32.gmra.mxu0 %v468_v15  ;;  %v574_v49 = vand.u32 2147483648, %v61_v45  ;;  %vm568_vm10 = vweird.f32 %v61_v45  ;;  %v572_v50 = vand.u32 2147483647, %v61_v45 }
 0x183   :  { %vm573_vm12 = vcmp.eq.f32.partialorder %v572_v50, 8.507059e+37 }
 0x184   :  { %v258_v44 = vpop.permute.xlu1 %257 }
 0x185   :  { %v264_v58 = vsel %vm239_vm13, %v258_v44, 0.0  ;;  %vm583_vm13 = vweird.f32 %v62_v59 }
 0x186   :  { %v269_v5 = vadd.f32 %v264_v58, %v219_v60 }
 0x187   :  { %v384_v54 = vpop.permute.xlu2 %383 }
 0x188   :  { %vm389_vm2 = vcmp.eq.s32.totalorder %v1235_v53, %v384_v54 }
 0x18d   :  { %v284_v48 = vpop.permute.xlu1 %283 }
 0x18e   :  { %vm289_vm14 = vcmp.eq.s32.totalorder %v1235_v53, %v284_v48 }
 0x18f   :  { %v314_v63 = vsel %vm289_vm14, %v308_v51, 0.0 }
 0x190   :  { %v319_v7 = vadd.f32 %v314_v63, %v269_v5  ;;  %v458_v10 = vpop.permute.xlu2 %457  ;;  %v589_v5 = vand.u32 2147483648, %v62_v59 }
 0x191   :  { %v464_v24 = vsel %vm439_vm1, %v458_v10, 0.0 }
 0x193   :  { %v506_v52 = vpop.f32.mrf.mxu0 }
 0x194   :  { %v547_v57 = vmul.f32 %v546_v9, %v506_v52  ;;  %v575_v52 = vor.u32 1.1754944e-38, %v574_v49 }
 0x196   :  { %v595_v61 = vadd.f32 %v1394_v13, %v547_v57  ;;  %v358_v62 = vpop.permute.xlu1 %357  ;;  %v856_v57 = vld [vmem:[%s1521_s5 + $0x30] sm:$0xff] }
 0x197   :  { %v364_v6 = vsel %vm339_vm15, %v358_v62, 0.0  ;;  %746 = vmatpush.msrb.mxu2 %v856_v57  ;;  %v854_v62 = vld [vmem:[%s1521_s5 + $0x20] sm:$0xff] }
 0x198   :  { %958 = vtanh.f32 %v595_v61  ;;  %v369_v12 = vadd.f32 %v364_v6, %v319_v7  ;;  %v855_v61 = vld [vmem:[%s1521_s5 + $0x28] sm:$0xff]  ;;  %v587_v7 = vand.u32 2147483647, %v62_v59 }
 0x199   :  { %960 = vrcp.f32 %v60_v42  ;;  %747 = vmatpush.msrb.mxu2 %v855_v61 }
 0x19a   :  { %vm588_vm1 = vcmp.eq.f32.partialorder %v587_v7, 8.507059e+37 }
 0x19b   :  { %748 = vmatpush.msrb.mxu2 %v854_v62 }
 0x19e   :  { %v959_v11 = vpop.eup %958 }
 0x19f   :  { %v408_v14 = vpop.permute.xlu1 %407  ;;  %847 = vmatmul.msk.f32.gmra.mxu1 %vm609_vm0, %v959_v11  ;;  %v961_v16 = vpop.eup %960 }
 0x1a0   :  { %v414_v27 = vsel %vm389_vm2, %v408_v14, 0.0  ;;  %v549_v26 = vmul.f32 %v961_v16, %v60_v42  ;;  %vm554_vm5 = vweird.f32 %v961_v16 }
 0x1a1   :  { %v419_v32 = vadd.f32 %v414_v27, %v369_v12  ;;  %vm555_vm7 = vmor %vm553_vm6, %vm554_vm5  ;;  %v590_v12 = vor.u32 1.1754944e-38, %v589_v5 }
 0x1a2   :  { %v550_v18 = vsub.f32 1.0, %v549_v26 }
 0x1a3   :  { %v469_v30 = vadd.f32 %v464_v24, %v419_v32 }
 0x1a4   :  { %v551_v31 = vmul.f32 %v961_v16, %v550_v18 }
 0x1a5   :  { %514 = vmatmul.f32.gmra.mxu0 %v469_v30 }
 0x1a6   :  { %v552_v8 = vadd.f32 %v961_v16, %v551_v31 }
 0x1a8   :  { %v556_v55 = vsel %vm555_vm7, %v961_v16, %v552_v8  ;;  %v872_v8 = vld [vmem:[%s1521_s5 + $0x98] sm:$0xff] }
 0x1a9   :  { %v665_v17 = vpop.permute.xlu1 %664 }
 0x1aa   :  { %vm666_vm4 = vcmp.eq.s32.totalorder %v1235_v53, %v665_v17  ;;  %v560_v53 = vor.u32 1.1754944e-38, %v559_v19  ;;  %v867_v17 = vld [vmem:[%s1521_s5 + $0x78] sm:$0xff]  ;;  %v871_v19 = vld [vmem:[%s1521_s5 + $0x90] sm:$0xff] }
 0x1ab   :  { %v851_v4 = vsel %vm666_vm4, 1.0, %v990_v39  ;;  %v865_v39 = vld [vmem:[%s1521_s5 + $0x68] sm:$0xff] }
 0x1ac   :  { %852 = vmatmul.msk.f32.vlgmr.msra.gmra.mxu2 %vm671_vm3, %v851_v4  ;;  %v561_v41 = vsel %vm558_vm8, %v560_v53, %v556_v55  ;;  %v864_v4 = vld [vmem:[%s1521_s5 + $0x60] sm:$0xff]  ;;  %v870_v55 = vld [vmem:[%s1521_s5 + $0x88] sm:$0xff] }
 0x1ad   :  { %803 = vmatpush.msra.mxu2 %v867_v17  ;;  %v869_v53 = vld [vmem:[%s1521_s5 + $0x80] sm:$0xff] }
 0x1af   :  { %804 = vmatpush.msra.mxu2 %v866_v37 }
 0x1b1   :  { %805 = vmatpush.msra.mxu2 %v865_v39 }
 0x1b3   :  { %806 = vmatpush.msra.mxu2 %v864_v4 }
 0x1d0   :  { %v509_v40 = vpop.f32.mrf.mxu0 }
 0x1d1   :  { %v562_v43 = vmul.f32 %v561_v41, %v509_v40 }
 0x1d3   :  { %v596_v15 = vadd.f32 %v1394_v13, %v562_v43 }
 0x1d5   :  { %962 = vtanh.f32 %v596_v15 }
 0x1d8   :  { %v642_v44 = vpop.f32.mrf.mxu1 }
 0x1d9   :  { %v643_v20 = vadd.f32 %v1442_v25, %v642_v44 }
 0x1db   :  { %v963_v0 = vpop.eup %962  ;;  %964 = vtanh.f32 %v643_v20  ;;  %v951_v20 = vld [vmem:[%s1518_s7 + $0x2] ss:$0 sm:$0xff] }
 0x1dc   :  { %848 = vmatmul.msk.f32.gmra.mxu1 %vm609_vm0, %v963_v0  ;;  %966 = vrcp.f32 %v61_v45 }
 0x1e1   :  { %v965_v22 = vpop.eup %964 }
 0x1e2   :  { %853 = vmatmul.msk.f32.vlgmr.msra.gmra.mxu3 %vm609_vm0, %v965_v22  ;;  %v967_v46 = vpop.eup %966 }
 0x1e3   :  { %v564_v47 = vmul.f32 %v967_v46, %v61_v45  ;;  %vm569_vm9 = vweird.f32 %v967_v46 }
 0x1e4   :  { %vm570_vm11 = vmor %vm568_vm10, %vm569_vm9 }
 0x1e5   :  { %v565_v3 = vsub.f32 1.0, %v564_v47 }
 0x1e7   :  { %v566_v48 = vmul.f32 %v967_v46, %v565_v3 }
 0x1e9   :  { %v567_v21 = vadd.f32 %v967_v46, %v566_v48 }
 0x1eb   :  { %v571_v51 = vsel %vm570_vm11, %v967_v46, %v567_v21 }
 0x1ec   :  { %v576_v54 = vsel %vm573_vm12, %v575_v52, %v571_v51 }
 0x1fe   :  { %v512_v9 = vpop.f32.mrf.mxu0 }
 0x1ff   :  { %v577_v29 = vmul.f32 %v576_v54, %v512_v9 }
 0x201   :  { %v597_v1 = vadd.f32 %v1394_v13, %v577_v29 }
 0x203   :  { %968 = vtanh.f32 %v597_v1 }
 0x204   :  { %970 = vrcp.f32 %v62_v59 }
 0x209   :  { %v969_v58 = vpop.eup %968 }
 0x20a   :  { %849 = vmatmul.msk.f32.gmra.mxu1 %vm609_vm0, %v969_v58  ;;  %v971_v60 = vpop.eup %970 }
 0x20b   :  { %v579_v63 = vmul.f32 %v971_v60, %v62_v59  ;;  %vm584_vm14 = vweird.f32 %v971_v60 }
 0x20c   :  { %vm585_vm15 = vmor %vm583_vm13, %vm584_vm14 }
 0x20d   :  { %v580_v2 = vsub.f32 1.0, %v579_v63 }
 0x20f   :  { %v581_v23 = vmul.f32 %v971_v60, %v580_v2 }
 0x211   :  { %v582_v6 = vadd.f32 %v971_v60, %v581_v23 }
 0x213   :  { %v586_v14 = vsel %vm585_vm15, %v971_v60, %v582_v6 }
 0x214   :  { %v591_v24 = vsel %vm588_vm1, %v590_v12, %v586_v14 }
 0x21c   :  { %v645_v10 = vpop.f32.mrf.mxu1 }
 0x21d   :  { %v646_v11 = vadd.f32 %v1442_v25, %v645_v10 }
 0x21f   :  { %972 = vtanh.f32 %v646_v11 }
 0x222   :  { %v515_v27 = vpop.f32.mrf.mxu0 }
 0x223   :  { %v592_v32 = vmul.f32 %v591_v24, %v515_v27 }
 0x225   :  { %v973_v30 = vpop.eup %972  ;;  %v598_v42 = vadd.f32 %v1394_v13, %v592_v32  ;;  %v859_v13 = vld [vmem:[%s1521_s5 + $0x40] sm:$0xff] }
 0x226   :  { %858 = vmatmul.msk.f32.vlgmr.msrb.gmra.mxu2 %vm609_vm0, %v973_v30  ;;  %777 = vmatpush.msrb.mxu3 %v859_v13 }
 0x227   :  { %974 = vtanh.f32 %v598_v42 }
 0x228   :  { %832 = vmatpush.msra.mxu3 %v872_v8 }
 0x22a   :  { %833 = vmatpush.msra.mxu3 %v871_v19 }
 0x22c   :  { %834 = vmatpush.msra.mxu3 %v870_v55 }
 0x22d   :  { %v975_v16 = vpop.eup %974 }
 0x22e   :  { %850 = vmatmul.msk.f32.gmra.mxu1 %vm609_vm0, %v975_v16  ;;  %835 = vmatpush.msra.mxu3 %v869_v53 }
 0x22f   :  { %v692_v15 = vpop.f32.mrf.mxu2 }
 0x230   :  { %v696_v45 = vadd.f32 %v951_v20, %v692_v15 }
 0x259   :  { %v648_v35 = vpop.f32.mrf.mxu1 }
 0x25a   :  { %v649_v26 = vadd.f32 %v1442_v25, %v648_v35 }
 0x25c   :  { %976 = vtanh.f32 %v649_v26 }
 0x262   :  { %v977_v36 = vpop.eup %976 }
 0x263   :  { %863 = vmatmul.msk.f32.vlgmr.msrb.gmra.mxu3 %vm609_vm0, %v977_v36 }
 0x265   :  { %v721_v44 = vpop.f32.mrf.mxu3 }
 0x266   :  { %v724_v46 = vadd.f32 %v721_v44, %v696_v45 }
 0x287   :  { %v651_v18 = vpop.f32.mrf.mxu1 }
 0x288   :  { %v652_v31 = vadd.f32 %v1442_v25, %v651_v18 }
 0x28a   :  { %978 = vtanh.f32 %v652_v31 }
 0x290   :  { %v979_v28 = vpop.eup %978 }
 0x291   :  { %868 = vmatmul.msk.f32.vlgmr.msra.gmra.mxu2 %vm609_vm0, %v979_v28 }
 0x2a9   :  { %v750_v0 = vpop.f32.mrf.mxu2 }
 0x2aa   :  { %v753_v47 = vadd.f32 %v750_v0, %v724_v46 }
 0x2ab   :  { %v654_v40 = vpop.f32.mrf.mxu1 }
 0x2ac   :  { %v655_v41 = vadd.f32 %v1442_v25, %v654_v40 }
 0x2ae   :  { %980 = vtanh.f32 %v655_v41 }
 0x2b4   :  { %v981_v43 = vpop.eup %980 }
 0x2b5   :  { %873 = vmatmul.msk.f32.vlgmr.msra.gmra.mxu3 %vm609_vm0, %v981_v43 }
 0x2e6   :  { %v779_v22 = vpop.f32.mrf.mxu3 }
 0x2e7   :  { %v782_v48 = vadd.f32 %v779_v22, %v753_v47 }
 0x314   :  { %v808_v3 = vpop.f32.mrf.mxu2 }
 0x315   :  { %v811_v21 = vadd.f32 %v808_v3, %v782_v48 }
 0x338   :  { %v837_v49 = vpop.f32.mrf.mxu3 }
 0x339   :  { %v840_v25 = vadd.f32 %v837_v49, %v811_v21 }
 0x33b   :  { %841 = vst [vmem:[%s1523_s8] sm:$0xff] %v840_v25 }

</bundles_post_ra>
